<compile_context>
chip_gen: v6e
topology: v6e:2x2x1
jax: 0.10.0
libtpu: 0.0.40
codegen_flags: <defaults>
</compile_context>

<pallas_src>
import math

import jax
import jax.numpy as jnp
from jax.experimental import pallas as pl
from jax.experimental.pallas import tpu as pltpu


def _bias_kernel(x_ref, b_ref, o_ref):
    # x_ref: (tm, tn) tile, b_ref: (1, tn) broadcast row -> pure VPU add.
    o_ref[...] = x_ref[...] + b_ref[...]


def _lcm(a, b):
    return a * b // math.gcd(a, b)


def bias_forward(x, bias_param, *, tm=512, max_tn=2048, force_pallas=False):
    """out = x + bias, bias broadcast over leading dims of x."""
    orig_shape = x.shape
    nodes = bias_param.shape[0]
    assert orig_shape[-1] == nodes, "last dim of input must equal nodes"

    # Keep arithmetic in the input dtype (no silent f32 promotion for bf16).
    bias_param = bias_param.astype(x.dtype)

    M = 1
    for d in orig_shape[:-1]:
        M *= d

    # A standalone elementwise add is already at HBM roofline under XLA
    # fusion; only use Pallas for genuinely large tensors (or when forced).
    if M == 0 or (not force_pallas and M * nodes < (1 << 20)):
        return x + bias_param

    x2d = x.reshape(M, nodes)

    # ---- lane packing: only when it costs nothing (no row padding) ---------
    if nodes % 128 == 0:
        p = 1
    else:
        p = _lcm(nodes, 128) // nodes
        if M % p != 0:
            p = 1  # ragged: keep full lane extent, accept masked stores
    R = M // p
    L = nodes * p
    xp = x2d.reshape(R, L)
    bp = (jnp.tile(bias_param, p) if p > 1 else bias_param).reshape(1, L)

    itemsize = jnp.dtype(x.dtype).itemsize
    sub = max(8, 32 // max(1, itemsize))  # sublane multiple: 8 f32, 16 bf16, 32 int8

    # ---- column tiling (no padding: boundary blocks masked by Pallas) ------
    if L <= max_tn or L % 128 != 0:
        tn = L  # full lane extent (always a legal block dim)
    else:
        tn = max_tn  # multiple of 128
    n_col = pl.cdiv(L, tn)

    # ---- row tiling: ~4 MiB tiles, sublane-multiple rows, no padding -------
    tile_bytes = 4 * 1024 * 1024
    tm_cap = max(sub, (tile_bytes // max(1, tn * itemsize)) // sub * sub)
    tm_eff = min(tm, tm_cap)
    if tm_eff >= R:
        tm_eff = R  # full row extent: legal regardless of divisibility
    n_row = pl.cdiv(R, tm_eff)

    # Megacore (v7x has 2 TCs): large single-block cases get >=2 parallel steps.
    if n_row * n_col == 1 and R >= 2 * sub and R * tn * itemsize >= (1 << 20):
        tm_eff = pl.cdiv(pl.cdiv(R, 2), sub) * sub
        n_row = pl.cdiv(R, tm_eff)

    # Rows innermost -> bias block index is constant along the inner axis,
    # so its (1, tn) copy is not re-issued every grid step.
    grid = (n_col, n_row)

    out = pl.pallas_call(
        _bias_kernel,
        out_shape=jax.ShapeDtypeStruct((R, L), x.dtype),
        grid_spec=pltpu.PrefetchScalarGridSpec(
            num_scalar_prefetch=0,
            grid=grid,
            in_specs=[
                pl.BlockSpec((tm_eff, tn), lambda j, i: (i, j)),
                pl.BlockSpec((1, tn), lambda j, i: (0, j)),
            ],
            out_specs=pl.BlockSpec((tm_eff, tn), lambda j, i: (i, j)),
        ),
        compiler_params=pltpu.CompilerParams(
            dimension_semantics=("parallel", "parallel"),
            # Double-buffered in+out ~4 MiB tiles ≈ 16 MiB working set.
            # 32 MiB is above v5e's 16 MiB scoped default and within v7x's
            # 64 MiB physical VMEM (leaves room for both TCs' working sets).
            vmem_limit_bytes=32 * 1024 * 1024,
        ),
    )(xp, bp)

    return out.reshape(orig_shape)


class BiasModule:
    """JAX equivalent of the PyTorch Bias module (forward pass only)."""
    # TODO(synk): custom backward (bias-gradient reduction over leading dims)
    # from the torch.autograd.Function is not implemented (forward-only).

    def __init__(self, nodes, key):
        # torch.randn(nodes) / sqrt(nodes), deterministic via PRNGKey
        self.bias = jax.random.normal(key, (nodes,), dtype=jnp.float32) / jnp.sqrt(
            jnp.float32(nodes)
        )

    def init_ident(self):
        self.bias = jnp.zeros_like(self.bias)
        return self

    def __call__(self, x, *, force_pallas=False):
        return bias_forward(x, self.bias, force_pallas=force_pallas)


if __name__ == "__main__":
    key = jax.random.PRNGKey(0)
    k_bias, k_x, k_x2, k_x3 = jax.random.split(key, 4)

    nodes = 32
    batch, seq = 2, 8
    module = BiasModule(nodes, k_bias)

    # Case 1: lane-packed path (32 -> 128 lanes, M % p == 0), single block.
    x = jax.random.normal(k_x, (batch, seq, nodes), dtype=jnp.float32)
    out = jax.block_until_ready(module(x, force_pallas=True))
    ref = x + module.bias
    assert out.shape == x.shape
    assert jnp.allclose(out, ref, atol=1e-6), "mismatch vs reference (packed)"

    # Case 2: ragged rows (M % p != 0) -> unpacked path with full lane extent
    # (masked lane stores, no wrapper padding).
    x2 = jax.random.normal(k_x2, (3, 13, nodes), dtype=jnp.float32)
    out2 = jax.block_until_ready(module(x2, force_pallas=True))
    ref2 = x2 + module.bias
    assert out2.shape == x2.shape
    assert jnp.allclose(out2, ref2, atol=1e-6), "mismatch vs reference (ragged)"

    # Case 3: multi-step grid with a partial boundary row block; Pallas masks
    # the boundary stores (no wrapper pad / output slice).
    nodes3 = 128
    module3 = BiasModule(nodes3, k_bias)
    x3 = jax.random.normal(k_x3, (3, 50, nodes3), dtype=jnp.float32)
    out3 = jax.block_until_ready(
        bias_forward(x3, module3.bias, tm=16, force_pallas=True)
    )
    ref3 = x3 + module3.bias
    assert out3.shape == x3.shape
    assert jnp.allclose(out3, ref3, atol=1e-6), "mismatch vs reference (boundary)"

    print("KERNEL_OK")
</pallas_src>

<mosaic_0001>
module attributes {stable_mosaic.version = 11 : i64} {
  func.func @_bias_kernel(%arg0: i32, %arg1: i32, %arg2: memref<4x128xf32, #tpu.memory_space<vmem>>, %arg3: memref<1x128xf32, #tpu.memory_space<vmem>>, %arg4: memref<4x128xf32, #tpu.memory_space<vmem>>) attributes {dimension_semantics = [#tpu.dimension_semantics<parallel>, #tpu.dimension_semantics<parallel>], iteration_bounds = array<i64: 1, 1>, scalar_prefetch = 0 : i64, scratch_operands = 0 : i64, tpu.core_type = #tpu.core_type<tc>, window_params = [{transform_indices = @transform_0, window_bounds = array<i64: 4, 128>}, {transform_indices = @transform_1, window_bounds = array<i64: 1, 128>}, {transform_indices = @transform_2, window_bounds = array<i64: 4, 128>}]} {
    %c0 = arith.constant 0 : index
    %c0_0 = arith.constant 0 : index
    %0 = vector.load %arg2[%c0, %c0_0] : memref<4x128xf32, #tpu.memory_space<vmem>>, vector<4x128xf32>
    %c0_1 = arith.constant 0 : index
    %c0_2 = arith.constant 0 : index
    %1 = vector.load %arg3[%c0_1, %c0_2] : memref<1x128xf32, #tpu.memory_space<vmem>>, vector<1x128xf32>
    %2 = vector.broadcast %1 : vector<1x128xf32> to vector<4x128xf32>
    %3 = arith.addf %0, %2 : vector<4x128xf32>
    %c0_3 = arith.constant 0 : index
    %c0_4 = arith.constant 0 : index
    %4 = vector.load %arg4[%c0_3, %c0_4] : memref<4x128xf32, #tpu.memory_space<vmem>>, vector<4x128xf32>
    tpu.vector_store %arg4[%c0_3, %c0_4], %3 {strides = array<i32>} : memref<4x128xf32, #tpu.memory_space<vmem>>, vector<4x128xf32>,
    return
  }
  func.func @transform_0(%arg0: i32, %arg1: i32) -> (i32, i32) {
    %c0_i32 = arith.constant 0 : i32
    return %arg1, %arg0 : i32, i32
  }
  func.func @transform_1(%arg0: i32, %arg1: i32) -> (i32, i32) {
    %c0_i32 = arith.constant 0 : i32
    %c0_i32_0 = arith.constant 0 : i32
    return %c0_i32, %arg0 : i32, i32
  }
  func.func @transform_2(%arg0: i32, %arg1: i32) -> (i32, i32) {
    %c0_i32 = arith.constant 0 : i32
    return %arg1, %arg0 : i32, i32
  }
}

</mosaic_0001>

<bundles_post_ra>
// kernel: tpu_custom_call.1
= control target key start
LH: loop header
LB: loop body
LE: loop exit
PB: predicated region body
PF: predicated region fallthrough
CT: control target
= control target key end

     0   :  { %7 = vsyncpa [#allocation3], 0  ;;  %s122_s0 = inlined_call_operand.hbm [shape: f32[4,128], index: 0, kind: input, shape index: {}]   ;;  %s123_s1 = inlined_call_operand.vmem [shape: f32[1,128], index: 1, kind: input, shape index: {}]   ;;  %s124_s2 = inlined_call_operand.hbm [shape: f32[4,128], index: 2, kind: output, shape index: {}]  }
   0x1   :  { %8 = vsyncpa [#allocation4], 0  ;;  %s96_s9 = smov [#allocation2]  }
   0x2   :  { %s15_s10 = sshll.u32 %s96_s9, 4  ;;  %s16_s10 = int_to_ptr.vmem [resolvable:$true] %s15_s10 }
   0x3   :  { %s60_s11 = scalar_lea.vmem %s16_s10, 64  ;;  %p65_p1 = scmp.lt.s32.totalorder %s16_s10, %s16_s10 }
   0x4   :  { %p61_p0 = scmp.ne.s32.totalorder %s16_s10, %s60_s11  ;;  %p66_p2 = scmp.lt.s32.totalorder %s60_s11, %s60_s11 }
   0x6   :  { %p67_p3 = por %p66_p2, %p65_p1 }
   0x8   :  { %p68_p4 = pnand %p67_p3, %p61_p0 }
   0xa   :  { %71 = shalt.err (!%p68_p4)
}
   0xb   :  { %18 = dma.hbm_to_vmem [thread:$0]  %s122_s0, 64, %s16_s10, [#allocation3]  }
   0xc   :  { %92 = dma.done.wait [#allocation3], 64  }
   0xd   :  { %93 = vsyncadd [#allocation3], 4294967232  ;;  %s97_s14 = smov [#allocation5]   ;;  %v24_v0 = vld [vmem:[#allocation2] sm:$0xf] }
   0xe   :  { %s40_s15 = sshll.u32 %s97_s14, 4  ;;  %v49_v1 = vld [vmem:[%s123_s1] ss:$0 sm:$0xff]  ;;  %s41_s15 = int_to_ptr.vmem [resolvable:$true] %s40_s15 }
   0xf   :  { %v32_v2 = vadd.f32 %v49_v1, %v24_v0  ;;  %s72_s18 = scalar_lea.vmem %s41_s15, 64  ;;  %p77_p6 = scmp.lt.s32.totalorder %s41_s15, %s41_s15 }
  0x10   :  { %p73_p5 = scmp.ne.s32.totalorder %s41_s15, %s72_s18  ;;  %p78_p7 = scmp.lt.s32.totalorder %s72_s18, %s72_s18 }
  0x11   :  { %33 = vst [vmem:[#allocation5] sm:$0xf] %v32_v2 }
  0x12   :  { %p79_p8 = por %p78_p7, %p77_p6 }
  0x14   :  { %p80_p9 = pnand %p79_p8, %p73_p5 }
  0x16   :  { %83 = shalt.err (!%p80_p9)
}
  0x17   :  { %43 = dma.vmem_to_hbm [thread:$0]  %s41_s15, 64, %s124_s2, [#allocation4]  }
  0x18   :  { %94 = dma.done.wait [#allocation4], 64  }
  0x19   :  { %95 = vsyncadd [#allocation4], 4294967232 }
  0x1a   :  { %47 = vsyncpa [#allocation3], 1 }
  0x1b   :  { %48 = vsyncpa [#allocation4], 1 }

</bundles_post_ra>
